<compile_context>
chip_gen: v5e
topology: v5e:2x2
jax: 0.10.0
libtpu: 0.0.40
codegen_flags: <defaults>
</compile_context>

<pallas_src>
import functools

import jax
import jax.numpy as jnp
from jax import lax
from jax.experimental import pallas as pl
from jax.experimental.pallas import tpu as pltpu

LANE = 128  # feature (lane) dims padded to this for lane-dense matmuls
SUB = 16    # node (sublane) dim padded to this (bf16 sublane packing)


# ----------------------------------------------------------------------------
# Pallas kernel: full forward pass fused
# ----------------------------------------------------------------------------
def _intra_lp_kernel(adj_ref, x_ref, w1_ref, b1_ref, w2_ref, b2_ref, out_ref):
    adj = adj_ref[...]  # bf16 (n_p, n_p)

    # Layer 1: H1 = relu(A_hat @ (X @ W1) + b1)   -- bf16 MXU inputs, f32 accum.
    xw1 = jnp.dot(x_ref[...], w1_ref[...], preferred_element_type=jnp.float32)
    h1 = jnp.dot(adj, xw1.astype(jnp.bfloat16),
                 preferred_element_type=jnp.float32)
    h1 = jnp.maximum(h1 + b1_ref[...], 0.0)          # (1, Fh) bias broadcast

    # Layer 2: H2 = A_hat @ (H1 @ W2) + b2
    hw2 = jnp.dot(h1.astype(jnp.bfloat16), w2_ref[...],
                  preferred_element_type=jnp.float32)
    h2 = jnp.dot(adj, hw2.astype(jnp.bfloat16),
                 preferred_element_type=jnp.float32)
    h2 = h2 + b2_ref[...]

    # Decoder: sigmoid(H2 @ H2^T).  Contract the last dim of both operands so
    # the MXU consumes H2 directly (no vxpose/TRF transpose pass).
    h2b = h2.astype(jnp.bfloat16)
    s = lax.dot_general(
        h2b, h2b,
        dimension_numbers=(((1,), (1,)), ((), ())),
        preferred_element_type=jnp.float32,
    )
    # sigmoid(s) = 1 / (1 + exp(-s)); approx reciprocal rides the EUP slot.
    sig = pl.reciprocal(1.0 + jnp.exp(-s), approx=True)
    out_ref[...] = jnp.clip(sig, 0.0, 1.0).astype(out_ref.dtype)


def _full_spec(shape):
    # Single whole-array block (everything here fits comfortably in VMEM);
    # block_shape == full array shape relaxes the (8,128) constraint.
    return pl.BlockSpec(shape, lambda: (0,) * len(shape))


def _round_up(n, m):
    return ((n + m - 1) // m) * m


def _pad2d(a, rows, cols):
    r, c = a.shape
    return jnp.pad(a, ((0, rows - r), (0, cols - c)))


# ----------------------------------------------------------------------------
# Glue: GCN normalization + fused forward wrapper (all inside one jit)
# ----------------------------------------------------------------------------
def build_norm_adj(edge_index, num_nodes):
    """D^-1/2 (A + I) D^-1/2 with A[dst, src] = 1 (PyG source->target flow)."""
    src, dst = edge_index[0], edge_index[1]
    adj = jnp.zeros((num_nodes, num_nodes), jnp.float32)
    adj = adj.at[dst, src].set(1.0)
    # Add self-loops, de-duplicating any explicit ones already in edge_index
    # (matches PyG gcn_norm for unweighted graphs: diagonal is exactly 1, never 2).
    eye = jnp.eye(num_nodes, dtype=bool)
    adj = jnp.where(eye, 1.0, adj)
    deg = adj.sum(axis=1)
    dinv = jnp.where(deg > 0, 1.0 / jnp.sqrt(deg), 0.0)
    return dinv[:, None] * adj * dinv[None, :]


def glorot(key, shape):
    fan_in, fan_out = shape
    limit = jnp.sqrt(6.0 / (fan_in + fan_out))
    return jax.random.uniform(key, shape, jnp.float32, -limit, limit)


@functools.partial(jax.jit, static_argnames=())
def intra_lp_forward(x, edge_index, params):
    n, f_in = x.shape
    f_hid = params["w1"].shape[1]
    f_out = params["w2"].shape[1]

    adj = build_norm_adj(edge_index, n)

    # Host-side zero padding: node axis to the bf16 sublane pack (16), feature
    # axes to the 128-lane width.  bf16 for everything the MXU consumes; biases
    # stay f32 (added after the f32 accumulate).
    n_p = _round_up(n, SUB)
    fi_p = _round_up(f_in, LANE)
    fh_p = _round_up(f_hid, LANE)
    fo_p = _round_up(f_out, LANE)

    adj_p = _pad2d(adj, n_p, n_p).astype(jnp.bfloat16)
    x_p = _pad2d(x, n_p, fi_p).astype(jnp.bfloat16)
    w1_p = _pad2d(params["w1"], fi_p, fh_p).astype(jnp.bfloat16)
    w2_p = _pad2d(params["w2"], fh_p, fo_p).astype(jnp.bfloat16)
    b1_p = _pad2d(params["b1"].reshape(1, f_hid), 1, fh_p)   # f32
    b2_p = _pad2d(params["b2"].reshape(1, f_out), 1, fo_p)   # f32

    flops = 2 * (
        n_p * fi_p * fh_p          # X @ W1
        + n_p * n_p * fh_p         # A_hat @ XW1
        + n_p * fh_p * fo_p        # H1 @ W2
        + n_p * n_p * fo_p         # A_hat @ HW2
        + n_p * fo_p * n_p         # H2 @ H2^T
    )
    bytes_accessed = (
        adj_p.size * 2 + x_p.size * 2 + w1_p.size * 2 + w2_p.size * 2
        + b1_p.size * 4 + b2_p.size * 4 + n_p * n_p * 4
    )

    out_p = pl.pallas_call(
        _intra_lp_kernel,
        out_shape=jax.ShapeDtypeStruct((n_p, n_p), jnp.float32),
        in_specs=[
            _full_spec(adj_p.shape),
            _full_spec(x_p.shape),
            _full_spec(w1_p.shape),
            _full_spec(b1_p.shape),
            _full_spec(w2_p.shape),
            _full_spec(b2_p.shape),
        ],
        out_specs=_full_spec((n_p, n_p)),
        cost_estimate=pl.CostEstimate(
            flops=flops, transcendentals=n_p * n_p,
            bytes_accessed=bytes_accessed),
    )(adj_p, x_p, w1_p, b1_p, w2_p, b2_p)

    return out_p[:n, :n]


# ----------------------------------------------------------------------------
# Main
# ----------------------------------------------------------------------------
if __name__ == "__main__":
    # Small, forward-consistent shapes.
    N = 16                 # number of graph nodes
    INTRA_LP_LAYER1 = 16   # input feature dim
    INTRA_LP_LAYER2 = 32   # hidden dim
    INTRA_LP_LAYER3 = 8    # output embedding dim

    key = jax.random.PRNGKey(0)
    k_x, k_w1, k_w2 = jax.random.split(key, 3)

    # Node features (Data.x): [N, F_in]
    x = jax.random.normal(k_x, (N, INTRA_LP_LAYER1), jnp.float32)

    # Deterministic undirected ring graph (Data.edge_index): [2, E]
    nodes = jnp.arange(N, dtype=jnp.int32)
    nxt = (nodes + 1) % N
    edge_index = jnp.stack(
        [jnp.concatenate([nodes, nxt]), jnp.concatenate([nxt, nodes])], axis=0
    )

    params = {
        "w1": glorot(k_w1, (INTRA_LP_LAYER1, INTRA_LP_LAYER2)),
        "b1": jnp.zeros((INTRA_LP_LAYER2,), jnp.float32),
        "w2": glorot(k_w2, (INTRA_LP_LAYER2, INTRA_LP_LAYER3)),
        "b2": jnp.zeros((INTRA_LP_LAYER3,), jnp.float32),
    }

    out = intra_lp_forward(x, edge_index, params)
    out = jax.block_until_ready(out)

    assert out.shape == (N, N)
    assert bool(jnp.all(jnp.isfinite(out)))
    assert bool(jnp.all((out >= 0.0) & (out <= 1.0)))  # sigmoid range
    print("KERNEL_OK")
</pallas_src>

<mosaic_0001>
module attributes {stable_mosaic.version = 11 : i64} {
  func.func @_intra_lp_kernel(%arg0: memref<16x16xbf16, #tpu.memory_space<vmem>>, %arg1: memref<16x128xbf16, #tpu.memory_space<vmem>>, %arg2: memref<128x128xbf16, #tpu.memory_space<vmem>>, %arg3: memref<1x128xf32, #tpu.memory_space<vmem>>, %arg4: memref<128x128xbf16, #tpu.memory_space<vmem>>, %arg5: memref<1x128xf32, #tpu.memory_space<vmem>>, %arg6: memref<16x16xf32, #tpu.memory_space<vmem>>) attributes {dimension_semantics = [], scalar_prefetch = 0 : i64, scratch_operands = 0 : i64, tpu.core_type = #tpu.core_type<tc>} {
    %c0 = arith.constant 0 : index
    %c0_0 = arith.constant 0 : index
    %0 = vector.load %arg0[%c0, %c0_0] : memref<16x16xbf16, #tpu.memory_space<vmem>>, vector<16x16xbf16>
    %c0_1 = arith.constant 0 : index
    %c0_2 = arith.constant 0 : index
    %1 = vector.load %arg1[%c0_1, %c0_2] : memref<16x128xbf16, #tpu.memory_space<vmem>>, vector<16x128xbf16>
    %c0_3 = arith.constant 0 : index
    %c0_4 = arith.constant 0 : index
    %2 = vector.load %arg2[%c0_3, %c0_4] : memref<128x128xbf16, #tpu.memory_space<vmem>>, vector<128x128xbf16>
    %cst = arith.constant dense<0.000000e+00> : vector<16x128xf32>
    %3 = tpu.matmul %1, %2, %cst {dimension_numbers = #tpu.dot_dimension_numbers<[1], [0], [0], [1], [0, 0, 1, 1], [], []>} : vector<16x128xbf16>, vector<128x128xbf16>, vector<16x128xf32> -> vector<16x128xf32>
    %4 = arith.truncf %3 : vector<16x128xf32> to vector<16x128xbf16>
    %cst_5 = arith.constant dense<0.000000e+00> : vector<16x128xf32>
    %5 = tpu.matmul %0, %4, %cst_5 {dimension_numbers = #tpu.dot_dimension_numbers<[1], [0], [0], [1], [0, 0, 1, 1], [], []>} : vector<16x16xbf16>, vector<16x128xbf16>, vector<16x128xf32> -> vector<16x128xf32>
    %c0_6 = arith.constant 0 : index
    %c0_7 = arith.constant 0 : index
    %6 = vector.load %arg3[%c0_6, %c0_7] : memref<1x128xf32, #tpu.memory_space<vmem>>, vector<1x128xf32>
    %7 = vector.broadcast %6 : vector<1x128xf32> to vector<16x128xf32>
    %8 = arith.addf %5, %7 : vector<16x128xf32>
    %cst_8 = arith.constant 0.000000e+00 : f32
    %9 = vector.broadcast %cst_8 : f32 to vector<16x128xf32>
    %10 = arith.maximumf %8, %9 : vector<16x128xf32>
    %11 = arith.truncf %10 : vector<16x128xf32> to vector<16x128xbf16>
    %c0_9 = arith.constant 0 : index
    %c0_10 = arith.constant 0 : index
    %12 = vector.load %arg4[%c0_9, %c0_10] : memref<128x128xbf16, #tpu.memory_space<vmem>>, vector<128x128xbf16>
    %cst_11 = arith.constant dense<0.000000e+00> : vector<16x128xf32>
    %13 = tpu.matmul %11, %12, %cst_11 {dimension_numbers = #tpu.dot_dimension_numbers<[1], [0], [0], [1], [0, 0, 1, 1], [], []>} : vector<16x128xbf16>, vector<128x128xbf16>, vector<16x128xf32> -> vector<16x128xf32>
    %14 = arith.truncf %13 : vector<16x128xf32> to vector<16x128xbf16>
    %cst_12 = arith.constant dense<0.000000e+00> : vector<16x128xf32>
    %15 = tpu.matmul %0, %14, %cst_12 {dimension_numbers = #tpu.dot_dimension_numbers<[1], [0], [0], [1], [0, 0, 1, 1], [], []>} : vector<16x16xbf16>, vector<16x128xbf16>, vector<16x128xf32> -> vector<16x128xf32>
    %c0_13 = arith.constant 0 : index
    %c0_14 = arith.constant 0 : index
    %16 = vector.load %arg5[%c0_13, %c0_14] : memref<1x128xf32, #tpu.memory_space<vmem>>, vector<1x128xf32>
    %17 = vector.broadcast %16 : vector<1x128xf32> to vector<16x128xf32>
    %18 = arith.addf %15, %17 : vector<16x128xf32>
    %19 = arith.truncf %18 : vector<16x128xf32> to vector<16x128xbf16>
    %cst_15 = arith.constant dense<0.000000e+00> : vector<16x16xf32>
    %20 = tpu.matmul %19, %19, %cst_15 {dimension_numbers = #tpu.dot_dimension_numbers<[1], [1], [0], [0], [0, 0, 1, 0], [], []>} : vector<16x128xbf16>, vector<16x128xbf16>, vector<16x16xf32> -> vector<16x16xf32>
    %cst_16 = arith.constant 0.000000e+00 : f32
    %21 = vector.broadcast %cst_16 : f32 to vector<16x16xf32>
    %22 = arith.subf %21, %20 : vector<16x16xf32>
    %23 = math.exp %22 : vector<16x16xf32>
    %cst_17 = arith.constant 1.000000e+00 : f32
    %24 = vector.broadcast %cst_17 : f32 to vector<16x16xf32>
    %25 = arith.addf %24, %23 : vector<16x16xf32>
    %26 = tpu.reciprocal %25 {approx = true} : vector<16x16xf32> -> vector<16x16xf32>
    %cst_18 = arith.constant 0.000000e+00 : f32
    %cst_19 = arith.constant 1.000000e+00 : f32
    %27 = vector.broadcast %cst_18 : f32 to vector<16x16xf32>
    %28 = arith.maximumf %27, %26 : vector<16x16xf32>
    %29 = vector.broadcast %cst_19 : f32 to vector<16x16xf32>
    %30 = arith.minimumf %29, %28 : vector<16x16xf32>
    %c0_20 = arith.constant 0 : index
    %c0_21 = arith.constant 0 : index
    %31 = vector.load %arg6[%c0_20, %c0_21] : memref<16x16xf32, #tpu.memory_space<vmem>>, vector<16x16xf32>
    tpu.vector_store %arg6[%c0_20, %c0_21], %30 {strides = array<i32>} : memref<16x16xf32, #tpu.memory_space<vmem>>, vector<16x16xf32>,
    return
  }
}

</mosaic_0001>

<bundles_post_ra>
// kernel: intra_lp_forward.1
= control target key start
LH: loop header
LB: loop body
LE: loop exit
PB: predicated region body
PF: predicated region fallthrough
CT: control target
= control target key end

     0   :  { %s526_s0 = inlined_call_operand.vmem [shape: bf16[16,16], index: 0, kind: input, shape index: {}]   ;;  %s527_s1 = inlined_call_operand.vmem [shape: bf16[16,128], index: 1, kind: input, shape index: {}]   ;;  %s528_s2 = inlined_call_operand.vmem [shape: bf16[128,128], index: 2, kind: input, shape index: {}]   ;;  %s529_s3 = inlined_call_operand.vmem [shape: f32[1,128], index: 3, kind: input, shape index: {}]   ;;  %s530_s4 = inlined_call_operand.vmem [shape: bf16[128,128], index: 4, kind: input, shape index: {}]   ;;  %s531_s5 = inlined_call_operand.vmem [shape: f32[1,128], index: 5, kind: input, shape index: {}]   ;;  %s532_s6 = inlined_call_operand.hbm [shape: f32[16,16], index: 6, kind: output, shape index: {}]  }
   0x1   :  { %v373_v0 = vld [vmem:[%s528_s2 + $0x38] sm:$0xff]  ;;  %v372_v1 = vld [vmem:[%s528_s2 + $0x30] sm:$0xff] }
   0x2   :  { %99 = vmatpush.bf16.msra.mxu0 %v373_v0 }
   0x3   :  { %11 = vsyncpa [#allocation3], 0  ;;  %v371_v2 = vld [vmem:[%s528_s2 + $0x28] sm:$0xff]  ;;  %v370_v3 = vld [vmem:[%s528_s2 + $0x20] sm:$0xff]  ;;  %vm123_vm0 = vcmask 130048   ;;  %s278_s11 = sshll.u32 %s532_s6, 4  ;;  %s279_s11 = int_to_ptr.hbm [resolvable:$true] %s278_s11 }
   0x4   :  { %v369_v4 = vld [vmem:[%s528_s2 + $0x18] sm:$0xff]  ;;  %v368_v5 = vld [vmem:[%s528_s2 + $0x10] sm:$0xff]  ;;  %v367_v6 = vld [vmem:[%s528_s2 + $0x8] sm:$0xff]  ;;  %s422_s12 = smov 128   ;;  %s423_s13 = smov 8  }
   0x5   :  { %v366_v7 = vld [vmem:[%s528_s2] sm:$0xff]  ;;  %v381_v9 = vld [vmem:[%s530_s4 + $0x38] sm:$0xff]  ;;  %v380_v10 = vld [vmem:[%s530_s4 + $0x30] sm:$0xff] }
   0x6   :  { %100 = vmatpush.bf16.msra.mxu0 %v372_v1  ;;  %v365_v8 = vld [vmem:[%s527_s1] sm:$0xff]  ;;  %208 = vmatpush.bf16.msra.mxu2 %v381_v9  ;;  %v379_v11 = vld [vmem:[%s530_s4 + $0x28] sm:$0xff]  ;;  %v377_v17 = vld [vmem:[%s530_s4 + $0x18] sm:$0xff] }
   0x7   :  { %v378_v12 = vld [vmem:[%s530_s4 + $0x20] sm:$0xff]  ;;  %v376_v18 = vld [vmem:[%s530_s4 + $0x10] sm:$0xff]  ;;  %v375_v19 = vld [vmem:[%s530_s4 + $0x8] sm:$0xff] }
   0x8   :  { %v364_v16 = vld [vmem:[%s526_s0] sm:$0xff] }
   0x9   :  { %v374_v20 = vld [vmem:[%s530_s4] sm:$0xff] }
   0xa   :  { %101 = vmatpush.bf16.msra.mxu0 %v371_v2  ;;  %209 = vmatpush.bf16.msra.mxu2 %v380_v10  ;;  %v385_v22 = vld [vmem:[%s529_s3] ss:$0 sm:$0xff]  ;;  %s421_s3 = smov [#allocation2]  }
   0xb   :  { %v386_v33 = vld [vmem:[%s531_s5] ss:$0 sm:$0xff]  ;;  %s276_s5 = sshll.u32 %s421_s3, 4  ;;  %s277_s5 = int_to_ptr.vmem [resolvable:$true] %s276_s5 }
   0xe   :  { %102 = vmatpush.bf16.msra.mxu0 %v370_v3  ;;  %210 = vmatpush.bf16.msra.mxu2 %v379_v11 }
  0x12   :  { %103 = vmatpush.bf16.msra.mxu0 %v369_v4  ;;  %211 = vmatpush.bf16.msra.mxu2 %v378_v12 }
  0x16   :  { %104 = vmatpush.bf16.msra.mxu0 %v368_v5  ;;  %212 = vmatpush.bf16.msra.mxu2 %v377_v17 }
  0x1a   :  { %105 = vmatpush.bf16.msra.mxu0 %v367_v6  ;;  %213 = vmatpush.bf16.msra.mxu2 %v376_v18 }
  0x1e   :  { %106 = vmatpush.bf16.msra.mxu0 %v366_v7  ;;  %214 = vmatpush.bf16.msra.mxu2 %v375_v19 }
  0x21   :  { %107 = vmatmul.bf16.vlgmr.msra.gmra.mxu0 %v365_v8 }
  0x22   :  { %215 = vmatpush.bf16.msra.mxu2 %v374_v20 }
  0x9e   :  { %v108_v13 = vpop.f32.mrf.mxu0 }
  0xa6   :  { %v110_v14 = vpop.f32.mrf.mxu0 }
  0xa7   :  { %v113_v15 = vpack.c.bf16 %v110_v14, %v108_v13 }
  0xa9   :  { %134 = vmatpush.bf16.msra.mxu1 %v113_v15 }
  0xac   :  { %330 = vmatmul.msk.bf16.vlgmr.msra.gmra.mxu1 %vm123_vm0, %v364_v16 }
 0x129   :  { %v136_v21 = vpop.f32.mrf.mxu1 }
 0x12a   :  { %v137_v23 = vadd.f32 %v385_v22, %v136_v21 }
 0x12c   :  { %v141_v26 = vmax.f32 %v137_v23, 0.0 }
 0x131   :  { %v138_v24 = vpop.f32.mrf.mxu1 }
 0x132   :  { %v139_v25 = vadd.f32 %v385_v22, %v138_v24 }
 0x134   :  { %v142_v27 = vmax.f32 %v139_v25, 0.0 }
 0x136   :  { %v143_v28 = vpack.c.bf16 %v142_v27, %v141_v26 }
 0x138   :  { %216 = vmatmul.bf16.vlgmr.msra.gmra.mxu2 %v143_v28 }
 0x1bb   :  { %v217_v29 = vpop.f32.mrf.mxu2 }
 0x1c3   :  { %v219_v30 = vpop.f32.mrf.mxu2 }
 0x1c4   :  { %v222_v31 = vpack.c.bf16 %v219_v30, %v217_v29 }
 0x1c6   :  { %234 = vmatpush.bf16.msra.mxu3 %v222_v31 }
 0x1c9   :  { %363 = vmatmul.msk.bf16.vlgmr.msra.gmra.mxu3 %vm123_vm0, %v364_v16 }
 0x24c   :  { %v236_v32 = vpop.f32.mrf.mxu3 }
 0x24d   :  { %v237_v35 = vadd.f32 %v386_v33, %v236_v32 }
 0x254   :  { %v238_v34 = vpop.f32.mrf.mxu3 }
 0x255   :  { %v239_v36 = vadd.f32 %v386_v33, %v238_v34 }
 0x257   :  { %v241_v37 = vpack.c.bf16 %v239_v36, %v237_v35 }
 0x259   :  { %249 = vmatpush.bf16.xpose.msrb.mxu1 %v241_v37 }
 0x260   :  { %250 = vmatmul.bf16.vlgmr.msrb.gmra.mxu1 %v241_v37 }
 0x2dd   :  { %v251_v38 = vpop.f32.mrf.mxu1 }
 0x2de   :  { %v256_v39 = vsub.f32 0.0, %v251_v38 }
 0x2e0   :  { %v258_v40 = vmul.f32 1.442695, %v256_v39 }
 0x2e2   :  { %387 = vpow2.f32 %v258_v40 }
 0x2e5   :  { %v253_v41 = vpop.f32.mrf.mxu1 }
 0x2e6   :  { %v257_v42 = vsub.f32 0.0, %v253_v41 }
 0x2e8   :  { %v388_v43 = vpop.eup %387  ;;  %v260_v44 = vmul.f32 1.442695, %v257_v42 }
 0x2e9   :  { %v262_v45 = vadd.f32 1.0, %v388_v43 }
 0x2ea   :  { %389 = vpow2.f32 %v260_v44 }
 0x2eb   :  { %391 = vrcp.f32 %v262_v45 }
 0x2f0   :  { %v390_v46 = vpop.eup %389 }
 0x2f1   :  { %v392_v47 = vpop.eup %391  ;;  %v263_v48 = vadd.f32 1.0, %v390_v46 }
 0x2f2   :  { %v266_v49 = vmax.f32 %v392_v47, 0.0 }
 0x2f3   :  { %393 = vrcp.f32 %v263_v48 }
 0x2f4   :  { %v268_v50 = vmin.f32 %v266_v49, 1.0 }
 0x2f6   :  { %270 = vst.msk [vmem:[#allocation2] sm:$0xff] %vm123_vm0, %v268_v50 }
 0x2f9   :  { %v394_v51 = vpop.eup %393 }
 0x2fa   :  { %v267_v52 = vmax.f32 %v394_v51, 0.0 }
 0x2fc   :  { %v269_v53 = vmin.f32 %v267_v52, 1.0 }
 0x2fe   :  { %271 = vst.msk [vmem:[#allocation2 + $0x8] sm:$0xff] %vm123_vm0, %v269_v53 }
 0x2ff   :  { %284 = dma.vmem_to_hbm [thread:$0]  %s277_s5, 256, %s279_s11, [#allocation3], %s422_s12, %s422_s12, %s423_s13  }
 0x300   :  { %419 = dma.done.wait [#allocation3], 256  }
 0x301   :  { %420 = vsyncadd [#allocation3], 4294967040 }
 0x302   :  { %289 = vsyncpa [#allocation3], 1 }

</bundles_post_ra>
